<compile_context>
chip_gen: v5e
topology: v5e:2x2
jax: 0.10.0
libtpu: 0.0.40
codegen_flags: <defaults>
</compile_context>

<pallas_src>
import jax
import jax.numpy as jnp
from jax.experimental import pallas as pl
from jax.experimental.pallas import tpu as pltpu

LN_EPS = 1e-5   # PyTorch nn.LayerNorm default
_LANE = 128


def _round_up(x, m):
    return (x + m - 1) // m * m


def _lddt_head_kernel(s_ref, g_ref, beta_ref,
                      w1_ref, b1_ref, w2_ref, b2_ref, w3_ref, b3_ref,
                      o_ref):
    # (tm, c_in) activation tile; LayerNorm statistics in f32 (biased variance,
    # PyTorch semantics). The channel block covers the full c_in, so the
    # reduction axis is complete.
    x = s_ref[...].astype(jnp.float32)
    mean = jnp.mean(x, axis=-1, keepdims=True)
    xc = x - mean
    var = jnp.mean(xc * xc, axis=-1, keepdims=True)
    inv = jax.lax.rsqrt(var + LN_EPS)
    xn = xc * inv * g_ref[...] + beta_ref[...]

    # Linear 1 + ReLU   (c_in -> c_hidden_pad)
    h1 = jnp.dot(xn, w1_ref[...], preferred_element_type=jnp.float32) + b1_ref[...]
    h1 = jnp.maximum(h1, 0.0)

    # Linear 2 + ReLU   (c_hidden_pad -> c_hidden_pad)
    h2 = jnp.dot(h1, w2_ref[...], preferred_element_type=jnp.float32) + b2_ref[...]
    h2 = jnp.maximum(h2, 0.0)

    # Linear 3 (logits) (c_hidden_pad -> no_bins_pad); padded columns are zero.
    out = jnp.dot(h2, w3_ref[...], preferred_element_type=jnp.float32) + b3_ref[...]

    o_ref[...] = out.astype(o_ref.dtype)


def _resident_spec(shape):
    """Resident (index never changes) block: single-buffered if supported."""
    idx = lambda i: (0, 0)
    if hasattr(pl, "Buffered"):
        try:
            return pl.BlockSpec(shape, idx, pipeline_mode=pl.Buffered(1))
        except TypeError:   # older jax without pipeline_mode kwarg
            pass
    return pl.BlockSpec(shape, idx)


def per_residue_lddt_ca_predictor(s, params, *, tm=512):
    """s: (B, L, c_in) -> (B, L, no_bins) logits."""
    B, L, c_in = s.shape
    M = B * L

    gamma, beta = params["ln_gamma"], params["ln_beta"]      # (c_in,)
    w1, b1 = params["w1"], params["b1"]                      # (c_in, c_h), (c_h,)
    w2, b2 = params["w2"], params["b2"]                      # (c_h, c_h),  (c_h,)
    w3, b3 = params["w3"], params["b3"]                      # (c_h, nb),   (nb,)
    c_hidden = w1.shape[1]
    no_bins = w3.shape[1]

    # ---- row tiling: large tiles, zero-pad ragged remainder ----------------
    tm_eff = min(_round_up(tm, 8), _round_up(M, 8))
    M_pad = _round_up(M, tm_eff)
    grid = M_pad // tm_eff

    s2d = s.reshape(M, c_in).astype(jnp.float32)
    if M_pad != M:
        s2d = jnp.pad(s2d, ((0, M_pad - M), (0, 0)))

    # ---- lane padding (done once in HBM): hidden / bin slabs -> 128 lanes --
    ch_p = _round_up(c_hidden, _LANE)
    nb_p = _round_up(no_bins, _LANE)
    f32 = jnp.float32

    g2 = gamma.astype(f32).reshape(1, c_in)
    be2 = beta.astype(f32).reshape(1, c_in)
    w1p = jnp.zeros((c_in, ch_p), f32).at[:, :c_hidden].set(w1)
    b1p = jnp.zeros((1, ch_p), f32).at[0, :c_hidden].set(b1)
    w2p = jnp.zeros((ch_p, ch_p), f32).at[:c_hidden, :c_hidden].set(w2)
    b2p = jnp.zeros((1, ch_p), f32).at[0, :c_hidden].set(b2)
    w3p = jnp.zeros((ch_p, nb_p), f32).at[:c_hidden, :no_bins].set(w3)
    b3p = jnp.zeros((1, nb_p), f32).at[0, :no_bins].set(b3)

    out2d = pl.pallas_call(
        _lddt_head_kernel,
        out_shape=jax.ShapeDtypeStruct((M_pad, nb_p), jnp.float32),
        grid_spec=pltpu.PrefetchScalarGridSpec(
            num_scalar_prefetch=0,
            grid=(grid,),
            in_specs=[
                pl.BlockSpec((tm_eff, c_in), lambda i: (i, 0)),  # streamed rows
                _resident_spec((1, c_in)),        # gamma
                _resident_spec((1, c_in)),        # beta
                _resident_spec((c_in, ch_p)),     # W1 (lane-padded)
                _resident_spec((1, ch_p)),        # b1
                _resident_spec((ch_p, ch_p)),     # W2
                _resident_spec((1, ch_p)),        # b2
                _resident_spec((ch_p, nb_p)),     # W3
                _resident_spec((1, nb_p)),        # b3
            ],
            out_specs=pl.BlockSpec((tm_eff, nb_p), lambda i: (i, 0)),  # lane-dense
        ),
        compiler_params=pltpu.CompilerParams(
            dimension_semantics=("parallel",),          # shards row axis across TCs
            vmem_limit_bytes=32 * 1024 * 1024,          # safe on v5e/v6e/v7x
        ),
    )(s2d, g2, be2, w1p, b1p, w2p, b2p, w3p, b3p)

    return out2d[:M, :no_bins].reshape(B, L, no_bins)


def init_params(key, c_in, c_hidden, no_bins):
    """Deterministic synthetic init. LayerNorm: gamma=1, beta=0 (PyTorch default).
    Linear weights stored as (in, out) = transpose of PyTorch's (out, in)."""
    k1, k2, k3, k4, k5, k6 = jax.random.split(key, 6)
    scale = 0.05
    return {
        "ln_gamma": jnp.ones((c_in,), jnp.float32),
        "ln_beta": jnp.zeros((c_in,), jnp.float32),
        "w1": scale * jax.random.normal(k1, (c_in, c_hidden), jnp.float32),
        "b1": scale * jax.random.normal(k2, (c_hidden,), jnp.float32),
        "w2": scale * jax.random.normal(k3, (c_hidden, c_hidden), jnp.float32),
        "b2": scale * jax.random.normal(k4, (c_hidden,), jnp.float32),
        "w3": scale * jax.random.normal(k5, (c_hidden, no_bins), jnp.float32),
        "b3": scale * jax.random.normal(k6, (no_bins,), jnp.float32),
    }


def _reference(s, p):
    x = s.astype(jnp.float32)
    mean = jnp.mean(x, axis=-1, keepdims=True)
    var = jnp.mean((x - mean) ** 2, axis=-1, keepdims=True)
    xn = (x - mean) * jax.lax.rsqrt(var + LN_EPS) * p["ln_gamma"] + p["ln_beta"]
    h = jax.nn.relu(xn @ p["w1"] + p["b1"])
    h = jax.nn.relu(h @ p["w2"] + p["b2"])
    return h @ p["w3"] + p["b3"]


if __name__ == "__main__":
    key = jax.random.PRNGKey(0)
    kp, ks1, ks2 = jax.random.split(key, 3)

    c_in, c_hidden, no_bins = 32, 32, 16
    params = init_params(kp, c_in, c_hidden, no_bins)

    # Case 1: small shape, single grid step (rows fit one tile).
    B1, L1 = 2, 32
    s1 = jax.random.normal(ks1, (B1, L1, c_in), jnp.float32)
    out1 = jax.block_until_ready(per_residue_lddt_ca_predictor(s1, params))
    ref1 = _reference(s1, params)
    assert out1.shape == (B1, L1, no_bins)
    assert jnp.allclose(out1, ref1, atol=1e-5, rtol=1e-5), "mismatch (case 1)"

    # Case 2: ragged row count + multi-step grid (exercises row padding path).
    B2, L2 = 2, 200
    s2 = jax.random.normal(ks2, (B2, L2, c_in), jnp.float32)
    out2 = jax.block_until_ready(
        per_residue_lddt_ca_predictor(s2, params, tm=128))
    ref2 = _reference(s2, params)
    assert out2.shape == (B2, L2, no_bins)
    assert jnp.allclose(out2, ref2, atol=1e-5, rtol=1e-5), "mismatch (case 2)"

    print("KERNEL_OK")
</pallas_src>

<mosaic_0001>
module attributes {stable_mosaic.version = 11 : i64} {
  func.func @_lddt_head_kernel(%arg0: i32, %arg1: memref<64x32xf32, #tpu.memory_space<vmem>>, %arg2: memref<1x32xf32, #tpu.memory_space<vmem>>, %arg3: memref<1x32xf32, #tpu.memory_space<vmem>>, %arg4: memref<32x128xf32, #tpu.memory_space<vmem>>, %arg5: memref<1x128xf32, #tpu.memory_space<vmem>>, %arg6: memref<128x128xf32, #tpu.memory_space<vmem>>, %arg7: memref<1x128xf32, #tpu.memory_space<vmem>>, %arg8: memref<128x128xf32, #tpu.memory_space<vmem>>, %arg9: memref<1x128xf32, #tpu.memory_space<vmem>>, %arg10: memref<64x128xf32, #tpu.memory_space<vmem>>) attributes {dimension_semantics = [#tpu.dimension_semantics<parallel>], iteration_bounds = array<i64: 1>, scalar_prefetch = 0 : i64, scratch_operands = 0 : i64, tpu.core_type = #tpu.core_type<tc>, window_params = [{transform_indices = @transform_0, window_bounds = array<i64: 64, 32>}, {pipeline_mode = #tpu.pipeline_mode<synchronous>, transform_indices = @transform_1, window_bounds = array<i64: 1, 32>}, {pipeline_mode = #tpu.pipeline_mode<synchronous>, transform_indices = @transform_2, window_bounds = array<i64: 1, 32>}, {pipeline_mode = #tpu.pipeline_mode<synchronous>, transform_indices = @transform_3, window_bounds = array<i64: 32, 128>}, {pipeline_mode = #tpu.pipeline_mode<synchronous>, transform_indices = @transform_4, window_bounds = array<i64: 1, 128>}, {pipeline_mode = #tpu.pipeline_mode<synchronous>, transform_indices = @transform_5, window_bounds = array<i64: 128, 128>}, {pipeline_mode = #tpu.pipeline_mode<synchronous>, transform_indices = @transform_6, window_bounds = array<i64: 1, 128>}, {pipeline_mode = #tpu.pipeline_mode<synchronous>, transform_indices = @transform_7, window_bounds = array<i64: 128, 128>}, {pipeline_mode = #tpu.pipeline_mode<synchronous>, transform_indices = @transform_8, window_bounds = array<i64: 1, 128>}, {transform_indices = @transform_9, window_bounds = array<i64: 64, 128>}]} {
    %c0 = arith.constant 0 : index
    %c0_0 = arith.constant 0 : index
    %0 = vector.load %arg1[%c0, %c0_0] : memref<64x32xf32, #tpu.memory_space<vmem>>, vector<64x32xf32>
    %cst = arith.constant dense<0.000000e+00> : vector<64xf32>
    %1 = vector.multi_reduction <add>, %0, %cst [1] : vector<64x32xf32> to vector<64xf32>
    %2 = vector.shape_cast %1 : vector<64xf32> to vector<64x1xf32>
    %cst_1 = arith.constant 3.200000e+01 : f32
    %3 = vector.broadcast %cst_1 : f32 to vector<64x1xf32>
    %4 = arith.divf %2, %3 : vector<64x1xf32>
    %5 = vector.broadcast %4 : vector<64x1xf32> to vector<64x32xf32>
    %6 = arith.subf %0, %5 : vector<64x32xf32>
    %7 = arith.mulf %6, %6 : vector<64x32xf32>
    %cst_2 = arith.constant dense<0.000000e+00> : vector<64xf32>
    %8 = vector.multi_reduction <add>, %7, %cst_2 [1] : vector<64x32xf32> to vector<64xf32>
    %9 = vector.shape_cast %8 : vector<64xf32> to vector<64x1xf32>
    %cst_3 = arith.constant 3.200000e+01 : f32
    %10 = vector.broadcast %cst_3 : f32 to vector<64x1xf32>
    %11 = arith.divf %9, %10 : vector<64x1xf32>
    %cst_4 = arith.constant 9.99999974E-6 : f32
    %12 = vector.broadcast %cst_4 : f32 to vector<64x1xf32>
    %13 = arith.addf %11, %12 : vector<64x1xf32>
    %14 = math.rsqrt %13 : vector<64x1xf32>
    %15 = vector.broadcast %14 : vector<64x1xf32> to vector<64x32xf32>
    %16 = arith.mulf %6, %15 : vector<64x32xf32>
    %c0_5 = arith.constant 0 : index
    %c0_6 = arith.constant 0 : index
    %17 = vector.load %arg2[%c0_5, %c0_6] : memref<1x32xf32, #tpu.memory_space<vmem>>, vector<1x32xf32>
    %18 = vector.broadcast %17 : vector<1x32xf32> to vector<64x32xf32>
    %19 = arith.mulf %16, %18 : vector<64x32xf32>
    %c0_7 = arith.constant 0 : index
    %c0_8 = arith.constant 0 : index
    %20 = vector.load %arg3[%c0_7, %c0_8] : memref<1x32xf32, #tpu.memory_space<vmem>>, vector<1x32xf32>
    %21 = vector.broadcast %20 : vector<1x32xf32> to vector<64x32xf32>
    %22 = arith.addf %19, %21 : vector<64x32xf32>
    %c0_9 = arith.constant 0 : index
    %c0_10 = arith.constant 0 : index
    %23 = vector.load %arg4[%c0_9, %c0_10] : memref<32x128xf32, #tpu.memory_space<vmem>>, vector<32x128xf32>
    %cst_11 = arith.constant dense<0.000000e+00> : vector<64x128xf32>
    %24 = tpu.matmul %22, %23, %cst_11 {dimension_numbers = #tpu.dot_dimension_numbers<[1], [0], [0], [1], [0, 0, 1, 1], [], []>} : vector<64x32xf32>, vector<32x128xf32>, vector<64x128xf32> -> vector<64x128xf32>
    %c0_12 = arith.constant 0 : index
    %c0_13 = arith.constant 0 : index
    %25 = vector.load %arg5[%c0_12, %c0_13] : memref<1x128xf32, #tpu.memory_space<vmem>>, vector<1x128xf32>
    %26 = vector.broadcast %25 : vector<1x128xf32> to vector<64x128xf32>
    %27 = arith.addf %24, %26 : vector<64x128xf32>
    %cst_14 = arith.constant 0.000000e+00 : f32
    %28 = vector.broadcast %cst_14 : f32 to vector<64x128xf32>
    %29 = arith.maximumf %27, %28 : vector<64x128xf32>
    %c0_15 = arith.constant 0 : index
    %c0_16 = arith.constant 0 : index
    %30 = vector.load %arg6[%c0_15, %c0_16] : memref<128x128xf32, #tpu.memory_space<vmem>>, vector<128x128xf32>
    %cst_17 = arith.constant dense<0.000000e+00> : vector<64x128xf32>
    %31 = tpu.matmul %29, %30, %cst_17 {dimension_numbers = #tpu.dot_dimension_numbers<[1], [0], [0], [1], [0, 0, 1, 1], [], []>} : vector<64x128xf32>, vector<128x128xf32>, vector<64x128xf32> -> vector<64x128xf32>
    %c0_18 = arith.constant 0 : index
    %c0_19 = arith.constant 0 : index
    %32 = vector.load %arg7[%c0_18, %c0_19] : memref<1x128xf32, #tpu.memory_space<vmem>>, vector<1x128xf32>
    %33 = vector.broadcast %32 : vector<1x128xf32> to vector<64x128xf32>
    %34 = arith.addf %31, %33 : vector<64x128xf32>
    %cst_20 = arith.constant 0.000000e+00 : f32
    %35 = vector.broadcast %cst_20 : f32 to vector<64x128xf32>
    %36 = arith.maximumf %34, %35 : vector<64x128xf32>
    %c0_21 = arith.constant 0 : index
    %c0_22 = arith.constant 0 : index
    %37 = vector.load %arg8[%c0_21, %c0_22] : memref<128x128xf32, #tpu.memory_space<vmem>>, vector<128x128xf32>
    %cst_23 = arith.constant dense<0.000000e+00> : vector<64x128xf32>
    %38 = tpu.matmul %36, %37, %cst_23 {dimension_numbers = #tpu.dot_dimension_numbers<[1], [0], [0], [1], [0, 0, 1, 1], [], []>} : vector<64x128xf32>, vector<128x128xf32>, vector<64x128xf32> -> vector<64x128xf32>
    %c0_24 = arith.constant 0 : index
    %c0_25 = arith.constant 0 : index
    %39 = vector.load %arg9[%c0_24, %c0_25] : memref<1x128xf32, #tpu.memory_space<vmem>>, vector<1x128xf32>
    %40 = vector.broadcast %39 : vector<1x128xf32> to vector<64x128xf32>
    %41 = arith.addf %38, %40 : vector<64x128xf32>
    %c0_26 = arith.constant 0 : index
    %c0_27 = arith.constant 0 : index
    %42 = vector.load %arg10[%c0_26, %c0_27] : memref<64x128xf32, #tpu.memory_space<vmem>>, vector<64x128xf32>
    tpu.vector_store %arg10[%c0_26, %c0_27], %41 {strides = array<i32>} : memref<64x128xf32, #tpu.memory_space<vmem>>, vector<64x128xf32>,
    return
  }
  func.func @transform_0(%arg0: i32) -> (i32, i32) {
    %c0_i32 = arith.constant 0 : i32
    %c0_i32_0 = arith.constant 0 : i32
    return %arg0, %c0_i32 : i32, i32
  }
  func.func @transform_1(%arg0: i32) -> (i32, i32) {
    %c0_i32 = arith.constant 0 : i32
    %c0_i32_0 = arith.constant 0 : i32
    %c0_i32_1 = arith.constant 0 : i32
    return %c0_i32, %c0_i32_0 : i32, i32
  }
  func.func @transform_2(%arg0: i32) -> (i32, i32) {
    %c0_i32 = arith.constant 0 : i32
    %c0_i32_0 = arith.constant 0 : i32
    %c0_i32_1 = arith.constant 0 : i32
    return %c0_i32, %c0_i32_0 : i32, i32
  }
  func.func @transform_3(%arg0: i32) -> (i32, i32) {
    %c0_i32 = arith.constant 0 : i32
    %c0_i32_0 = arith.constant 0 : i32
    %c0_i32_1 = arith.constant 0 : i32
    return %c0_i32, %c0_i32_0 : i32, i32
  }
  func.func @transform_4(%arg0: i32) -> (i32, i32) {
    %c0_i32 = arith.constant 0 : i32
    %c0_i32_0 = arith.constant 0 : i32
    %c0_i32_1 = arith.constant 0 : i32
    return %c0_i32, %c0_i32_0 : i32, i32
  }
  func.func @transform_5(%arg0: i32) -> (i32, i32) {
    %c0_i32 = arith.constant 0 : i32
    %c0_i32_0 = arith.constant 0 : i32
    %c0_i32_1 = arith.constant 0 : i32
    return %c0_i32, %c0_i32_0 : i32, i32
  }
  func.func @transform_6(%arg0: i32) -> (i32, i32) {
    %c0_i32 = arith.constant 0 : i32
    %c0_i32_0 = arith.constant 0 : i32
    %c0_i32_1 = arith.constant 0 : i32
    return %c0_i32, %c0_i32_0 : i32, i32
  }
  func.func @transform_7(%arg0: i32) -> (i32, i32) {
    %c0_i32 = arith.constant 0 : i32
    %c0_i32_0 = arith.constant 0 : i32
    %c0_i32_1 = arith.constant 0 : i32
    return %c0_i32, %c0_i32_0 : i32, i32
  }
  func.func @transform_8(%arg0: i32) -> (i32, i32) {
    %c0_i32 = arith.constant 0 : i32
    %c0_i32_0 = arith.constant 0 : i32
    %c0_i32_1 = arith.constant 0 : i32
    return %c0_i32, %c0_i32_0 : i32, i32
  }
  func.func @transform_9(%arg0: i32) -> (i32, i32) {
    %c0_i32 = arith.constant 0 : i32
    %c0_i32_0 = arith.constant 0 : i32
    return %arg0, %c0_i32 : i32, i32
  }
}

</mosaic_0001>

<bundles_post_ra>
// kernel: tpu_custom_call.1
= control target key start
LH: loop header
LB: loop body
LE: loop exit
PB: predicated region body
PF: predicated region fallthrough
CT: control target
= control target key end

     0   :  { %14 = vsyncpa [#allocation3], 0  ;;  %s932_s0 = inlined_call_operand.vmem [shape: f32[64,32], index: 0, kind: input, shape index: {}]   ;;  %s933_s1 = inlined_call_operand.vmem [shape: f32[1,32], index: 1, kind: input, shape index: {}]   ;;  %s934_s2 = inlined_call_operand.vmem [shape: f32[1,32], index: 2, kind: input, shape index: {}]   ;;  %s935_s3 = inlined_call_operand.vmem [shape: f32[32,128], index: 3, kind: input, shape index: {}]   ;;  %s936_s4 = inlined_call_operand.vmem [shape: f32[1,128], index: 4, kind: input, shape index: {}]   ;;  %s937_s5 = inlined_call_operand.hbm [shape: f32[128,128], index: 5, kind: input, shape index: {}]   ;;  %s938_s6 = inlined_call_operand.vmem [shape: f32[1,128], index: 6, kind: input, shape index: {}]   ;;  %s939_s7 = inlined_call_operand.hbm [shape: f32[128,128], index: 7, kind: input, shape index: {}]   ;;  %s940_s8 = inlined_call_operand.vmem [shape: f32[1,128], index: 8, kind: input, shape index: {}]   ;;  %s941_s9 = inlined_call_operand.hbm [shape: f32[64,128], index: 9, kind: output, shape index: {}]  }
   0x1   :  { %15 = vsyncpa [#allocation6], 0 }
   0x2   :  { %16 = vsyncpa [#allocation4], 0  ;;  %s31_s11 = sshll.u32 %s937_s5, 4  ;;  %s667_s12 = smov [#allocation2]   ;;  %s32_s11 = int_to_ptr.hbm [resolvable:$true] %s31_s11 }
   0x3   :  { %s33_s13 = sshll.u32 %s667_s12, 4  ;;  %s46_s16 = sshll.u32 %s939_s7, 4  ;;  %s34_s13 = int_to_ptr.vmem [resolvable:$true] %s33_s13  ;;  %s47_s16 = int_to_ptr.hbm [resolvable:$true] %s46_s16 }
   0x4   :  { %s668_s17 = smov 128   ;;  %s669_s18 = smov 8  }
   0x5   :  { %39 = dma.hbm_to_vmem [thread:$0]  %s32_s11, 2048, %s34_s13, [#allocation3], %s668_s17, %s668_s17, %s669_s18  }
   0x6   :  { %s670_s19 = smov [#allocation5]  }
   0x7   :  { %s48_s20 = sshll.u32 %s670_s19, 4  ;;  %s49_s20 = int_to_ptr.vmem [resolvable:$true] %s48_s20 }
   0x8   :  { %54 = dma.hbm_to_vmem [thread:$0]  %s47_s16, 2048, %s49_s20, [#allocation6], %s668_s17, %s668_s17, %s669_s18  }
   0x9   :  { %661 = dma.done.wait [#allocation3], 2048  }
   0xa   :  { %662 = vsyncadd [#allocation3], 4294965248 }
   0xb   :  { %663 = dma.done.wait [#allocation6], 2048  }
   0xc   :  { %664 = vsyncadd [#allocation6], 4294965248  ;;  %vm73_vm0 = vcmask 261120   ;;  %v69_v0 = vld [vmem:[%s932_s0 + $0x20] sm:$0xff]  ;;  %v67_v1 = vld [vmem:[%s932_s0 + $0x10] sm:$0xff]  ;;  %v671_v14 = vmov 32.0  }
   0xd   :  { %v65_v2 = vld [vmem:[%s932_s0] sm:$0xff]  ;;  %v86_v3 = vsel %vm73_vm0, %v69_v0, 0.0  ;;  %v80_v4 = vsel %vm73_vm0, %v67_v1, 0.0  ;;  %v70_v6 = vld [vmem:[%s932_s0 + $0x28] sm:$0xff]  ;;  %v68_v7 = vld [vmem:[%s932_s0 + $0x18] sm:$0xff]  ;;  %571 = vrcp.f32 %v671_v14  ;;  %s506_s29 = sshll.u32 %s941_s9, 4  ;;  %s507_s29 = int_to_ptr.hbm [resolvable:$true] %s506_s29 }
   0xe   :  { %v74_v5 = vsel %vm73_vm0, %v65_v2, 0.0  ;;  %87 = vadd.xlane.f32.xlu2 %v86_v3  ;;  %81 = vadd.xlane.f32.xlu1 %v80_v4  ;;  %v66_v8 = vld [vmem:[%s932_s0 + $0x8] sm:$0xff]  ;;  %v89_v9 = vsel %vm73_vm0, %v70_v6, 0.0  ;;  %v83_v10 = vsel %vm73_vm0, %v68_v7, 0.0  ;;  %v71_v12 = vld [vmem:[%s932_s0 + $0x30] sm:$0xff]  ;;  %v72_v40 = vld [vmem:[%s932_s0 + $0x38] sm:$0xff] }
   0xf   :  { %75 = vadd.xlane.f32.xlu0 %v74_v5  ;;  %v77_v11 = vsel %vm73_vm0, %v66_v8, 0.0  ;;  %v92_v13 = vsel %vm73_vm0, %v71_v12, 0.0  ;;  %v95_v45 = vsel %vm73_vm0, %v72_v40, 0.0  ;;  %v284_v58 = vld [vmem:[%s935_s3 + $0x18] sm:$0xff]  ;;  %v283_v59 = vld [vmem:[%s935_s3 + $0x10] sm:$0xff]  ;;  %v282_v60 = vld [vmem:[%s935_s3 + $0x8] sm:$0xff] }
  0x10   :  { %325 = vmatpush.msra.mxu0 %v284_v58  ;;  %v281_v61 = vld [vmem:[%s935_s3] sm:$0xff] }
  0x12   :  { %326 = vmatpush.msra.mxu0 %v283_v59 }
  0x13   :  { %v572_v15 = vpop.eup %571 }
  0x14   :  { %v99_v16 = vmul.f32 32.0, %v572_v15  ;;  %vm103_vm1 = vweird.f32 %v572_v15  ;;  %327 = vmatpush.msra.mxu0 %v282_v60 }
  0x16   :  { %90 = vadd.xlane.f32.xlu2 %v89_v9  ;;  %84 = vadd.xlane.f32.xlu1 %v83_v10  ;;  %v100_v17 = vsub.f32 1.0, %v99_v16 }
  0x17   :  { %78 = vadd.xlane.f32.xlu0 %v77_v11  ;;  %328 = vmatpush.msra.mxu0 %v281_v61 }
  0x18   :  { %v101_v18 = vmul.f32 %v572_v15, %v100_v17 }
  0x1a   :  { %v102_v19 = vadd.f32 %v572_v15, %v101_v18 }
  0x1c   :  { %v763_v20 = vsel %vm103_vm1, %v572_v15, %v102_v19 }
  0x1e   :  { %93 = vadd.xlane.f32.xlu1 %v92_v13 }
  0x81   :  { %v88_v21 = vpop.xlane.xlu2 %87  ;;  %v82_v22 = vpop.xlane.xlu1 %81 }
  0x82   :  { %v107_v23 = vmul.f32 %v763_v20, %v82_v22  ;;  %v76_v24 = vpop.xlane.xlu0 %75  ;;  %v109_v36 = vmul.f32 %v763_v20, %v88_v21 }
  0x83   :  { %v105_v25 = vmul.f32 %v763_v20, %v76_v24 }
  0x84   :  { %v767_v26 = vsub.f32 %v67_v1, %v107_v23  ;;  %v790_v43 = vsub.f32 %v69_v0, %v109_v36 }
  0x85   :  { %v769_v27 = vsub.f32 %v65_v2, %v105_v25 }
  0x86   :  { %v123_v28 = vmul.f32 %v767_v26, %v767_v26  ;;  %v125_v51 = vmul.f32 %v790_v43, %v790_v43 }
  0x87   :  { %v121_v29 = vmul.f32 %v769_v27, %v769_v27 }
  0x88   :  { %v135_v30 = vsel %vm73_vm0, %v123_v28, 0.0  ;;  %v141_v54 = vsel %vm73_vm0, %v125_v51, 0.0 }
  0x89   :  { %v91_v31 = vpop.xlane.xlu2 %90  ;;  %136 = vadd.xlane.f32.xlu1 %v135_v30  ;;  %v129_v32 = vsel %vm73_vm0, %v121_v29, 0.0  ;;  %v85_v33 = vpop.xlane.xlu1 %84 }
  0x8a   :  { %v110_v34 = vmul.f32 %v763_v20, %v91_v31  ;;  %130 = vadd.xlane.f32.xlu0 %v129_v32  ;;  %v79_v35 = vpop.xlane.xlu0 %78  ;;  %v108_v38 = vmul.f32 %v763_v20, %v85_v33 }
  0x8b   :  { %v106_v37 = vmul.f32 %v763_v20, %v79_v35  ;;  %v848_v35 = vld [vmem:[%s933_s1] ss:$0 sm:$0xff] }
  0x8c   :  { %v781_v39 = vsub.f32 %v70_v6, %v110_v34  ;;  %v792_v44 = vsub.f32 %v68_v7, %v108_v38 }
  0x8d   :  { %v786_v41 = vsub.f32 %v66_v8, %v106_v37 }
  0x8e   :  { %v126_v42 = vmul.f32 %v781_v39, %v781_v39  ;;  %v124_v52 = vmul.f32 %v792_v44, %v792_v44 }
  0x8f   :  { %v122_v46 = vmul.f32 %v786_v41, %v786_v41 }
  0x90   :  { %v144_v47 = vsel %vm73_vm0, %v126_v42, 0.0  ;;  %v138_v55 = vsel %vm73_vm0, %v124_v52, 0.0  ;;  %v857_v42 = vld [vmem:[%s934_s2] ss:$0 sm:$0xff] }
  0x91   :  { %145 = vadd.xlane.f32.xlu1 %v144_v47  ;;  %v132_v48 = vsel %vm73_vm0, %v122_v46, 0.0  ;;  %v94_v49 = vpop.xlane.xlu1 %93 }
  0x92   :  { %96 = vadd.xlane.f32.xlu0 %v95_v45  ;;  %133 = vadd.xlane.f32.xlu2 %v132_v48  ;;  %v111_v50 = vmul.f32 %v763_v20, %v94_v49 }
  0x94   :  { %v804_v53 = vsub.f32 %v71_v12, %v111_v50 }
  0x96   :  { %v127_v56 = vmul.f32 %v804_v53, %v804_v53 }
  0x98   :  { %v147_v57 = vsel %vm73_vm0, %v127_v56, 0.0 }
  0x9a   :  { %142 = vadd.xlane.f32.xlu0 %v141_v54  ;;  %139 = vadd.xlane.f32.xlu2 %v138_v55 }
  0xa2   :  { %148 = vadd.xlane.f32.xlu2 %v147_v57  ;;  %v364_v57 = vld [vmem:[#allocation2 + $0x10] sm:$0xff] }
  0xfc   :  { %v137_v62 = vpop.xlane.xlu1 %136 }
  0xfd   :  { %v155_v63 = vmul.f32 %v137_v62, %v763_v20  ;;  %v131_v0 = vpop.xlane.xlu0 %130 }
  0xfe   :  { %v153_v1 = vmul.f32 %v131_v0, %v763_v20 }
  0xff   :  { %v825_v2 = vadd.f32 1e-05, %v155_v63 }
 0x100   :  { %v161_v3 = vadd.f32 1e-05, %v153_v1 }
 0x101   :  { %573 = vrsqrt.f32 %v825_v2  ;;  %vm195_vm7 = vweird.f32 %v825_v2 }
 0x102   :  { %575 = vrsqrt.f32 %v161_v3  ;;  %vm175_vm3 = vweird.f32 %v161_v3 }
 0x104   :  { %v146_v16 = vpop.xlane.xlu1 %145 }
 0x105   :  { %v134_v4 = vpop.xlane.xlu2 %133  ;;  %v97_v5 = vpop.xlane.xlu0 %96  ;;  %v158_v29 = vmul.f32 %v146_v16, %v763_v20 }
 0x106   :  { %v154_v6 = vmul.f32 %v134_v4, %v763_v20  ;;  %v112_v7 = vmul.f32 %v763_v20, %v97_v5 }
 0x107   :  { %v830_v8 = vpop.eup %573  ;;  %v851_v38 = vadd.f32 1e-05, %v158_v29 }
 0x108   :  { %v576_v9 = vpop.eup %575  ;;  %v162_v10 = vadd.f32 1e-05, %v154_v6  ;;  %v832_v11 = vsub.f32 %v72_v40, %v112_v7  ;;  %v190_v12 = vmul.f32 %v830_v8, %v825_v2  ;;  %vm196_vm8 = vweird.f32 %v830_v8 }
 0x109   :  { %v170_v13 = vmul.f32 %v576_v9, %v161_v3  ;;  %vm176_vm2 = vweird.f32 %v576_v9  ;;  %vm866_vm10 = vmor %vm195_vm7, %vm196_vm8 }
 0x10a   :  { %577 = vrsqrt.f32 %v162_v10  ;;  %v128_v14 = vmul.f32 %v832_v11, %v832_v11  ;;  %v191_v18 = vmul.f32 %v830_v8, %v190_v12  ;;  %vm177_vm4 = vmor %vm175_vm3, %vm176_vm2  ;;  %vm185_vm5 = vweird.f32 %v162_v10 }
 0x10b   :  { %v171_v15 = vmul.f32 %v576_v9, %v170_v13  ;;  %vm225_vm2 = vweird.f32 %v851_v38 }
 0x10c   :  { %v150_v17 = vsel %vm73_vm0, %v128_v14, 0.0  ;;  %v192_v31 = vmul.f32 0.5, %v191_v18 }
 0x10d   :  { %v172_v19 = vmul.f32 0.5, %v171_v15  ;;  %v140_v21 = vpop.xlane.xlu2 %139  ;;  %151 = vadd.xlane.f32.xlu0 %v150_v17  ;;  %v143_v22 = vpop.xlane.xlu0 %142 }
 0x10e   :  { %v156_v23 = vmul.f32 %v140_v21, %v763_v20  ;;  %v157_v24 = vmul.f32 %v143_v22, %v763_v20  ;;  %v193_v45 = vsub.f32 1.5, %v192_v31  ;;  %v376_v21 = vld [vmem:[#allocation2 + $0x70] sm:$0xff] }
 0x10f   :  { %v173_v25 = vsub.f32 1.5, %v172_v19  ;;  %v377_v19 = vld [vmem:[#allocation2 + $0x78] sm:$0xff] }
 0x110   :  { %v578_v28 = vpop.eup %577  ;;  %v164_v30 = vadd.f32 1e-05, %v156_v23  ;;  %v843_v34 = vadd.f32 1e-05, %v157_v24  ;;  %v194_v54 = vmul.f32 %v830_v8, %v193_v45  ;;  %382 = vmatpush.msra.mxu1 %v377_v19  ;;  %528 = vmatpush.msra.mxu3 %v377_v19  ;;  %v443_v19 = vld [vmem:[#allocation5 + $0x60] sm:$0xff] }
 0x111   :  { %v174_v32 = vmul.f32 %v576_v9, %v173_v25  ;;  %v180_v33 = vmul.f32 %v578_v28, %v162_v10  ;;  %vm186_vm6 = vweird.f32 %v578_v28 }
 0x112   :  { %579 = vrsqrt.f32 %v164_v30  ;;  %vm187_vm9 = vmor %vm185_vm5, %vm186_vm6  ;;  %v198_v63 = vsel %vm866_vm10, %v830_v8, %v194_v54  ;;  %vm205_vm11 = vweird.f32 %v164_v30  ;;  %vm215_vm14 = vweird.f32 %v843_v34  ;;  %383 = vmatpush.msra.mxu1 %v376_v21  ;;  %529 = vmatpush.msra.mxu3 %v376_v21  ;;  %v367_v54 = vld [vmem:[#allocation2 + $0x28] sm:$0xff] }
 0x113   :  { %v178_v36 = vsel %vm177_vm4, %v576_v9, %v174_v32  ;;  %v181_v37 = vmul.f32 %v578_v28, %v180_v33  ;;  %581 = vrsqrt.f32 %v843_v34  ;;  %v251_v6 = vmul.f32 %v198_v63, %v767_v26 }
 0x114   :  { %v249_v40 = vmul.f32 %v178_v36, %v769_v27  ;;  %583 = vrsqrt.f32 %v851_v38 }
 0x115   :  { %v182_v46 = vmul.f32 0.5, %v181_v37  ;;  %v149_v47 = vpop.xlane.xlu2 %148  ;;  %v263_v8 = vmul.f32 %v848_v35, %v251_v6 }
 0x116   :  { %v261_v48 = vmul.f32 %v848_v35, %v249_v40  ;;  %v159_v27 = vmul.f32 %v149_v47, %v763_v20 }
 0x117   :  { %v183_v49 = vsub.f32 1.5, %v182_v46  ;;  %v275_v15 = vadd.f32 %v857_v42, %v263_v8 }
 0x118   :  { %v580_v50 = vpop.eup %579  ;;  %v273_v51 = vadd.f32 %v857_v42, %v261_v48  ;;  %v167_v61 = vadd.f32 1e-05, %v159_v27  ;;  %v374_v48 = vld [vmem:[#allocation2 + $0x60] sm:$0xff] }
 0x119   :  { %v582_v52 = vpop.eup %581  ;;  %v184_v55 = vmul.f32 %v578_v28, %v183_v49  ;;  %v200_v56 = vmul.f32 %v580_v50, %v164_v30  ;;  %vm206_vm12 = vweird.f32 %v580_v50  ;;  %v373_v49 = vld [vmem:[#allocation2 + $0x58] sm:$0xff]  ;;  %v370_v27 = vld [vmem:[#allocation2 + $0x40] sm:$0xff] }
 0x11a   :  { %v210_v58 = vmul.f32 %v582_v52, %v843_v34  ;;  %520 = vmatmul.msk.f32.vlgmr.msra.gmra.mxu0 %vm73_vm0, %v273_v51  ;;  %v584_v2 = vpop.eup %583  ;;  %585 = vrsqrt.f32 %v167_v61  ;;  %vm207_vm13 = vmor %vm205_vm11, %vm206_vm12  ;;  %vm216_vm15 = vweird.f32 %v582_v52  ;;  %vm235_vm5 = vweird.f32 %v167_v61  ;;  %v369_v51 = vld [vmem:[#allocation2 + $0x38] sm:$0xff] }
 0x11b   :  { %v188_v59 = vsel %vm187_vm9, %v578_v28, %v184_v55  ;;  %v201_v60 = vmul.f32 %v580_v50, %v200_v56  ;;  %v220_v7 = vmul.f32 %v584_v2, %v851_v38  ;;  %vm217_vm1 = vmor %vm215_vm14, %vm216_vm15  ;;  %vm226_vm3 = vweird.f32 %v584_v2  ;;  %v366_v55 = vld [vmem:[#allocation2 + $0x20] sm:$0xff]  ;;  %v365_v56 = vld [vmem:[#allocation2 + $0x18] sm:$0xff] }
 0x11c   :  { %v250_v62 = vmul.f32 %v188_v59, %v786_v41  ;;  %v211_v1 = vmul.f32 %v582_v52, %v210_v58  ;;  %vm227_vm4 = vmor %vm225_vm2, %vm226_vm3  ;;  %v363_v58 = vld [vmem:[#allocation2 + $0x8] sm:$0xff]  ;;  %v362_v59 = vld [vmem:[#allocation2] sm:$0xff] }
 0x11d   :  { %v202_v0 = vmul.f32 0.5, %v201_v60  ;;  %v221_v10 = vmul.f32 %v584_v2, %v220_v7 }
 0x11e   :  { %v262_v3 = vmul.f32 %v848_v35, %v250_v62  ;;  %v212_v9 = vmul.f32 0.5, %v211_v1 }
 0x11f   :  { %v203_v4 = vsub.f32 1.5, %v202_v0  ;;  %v222_v16 = vmul.f32 0.5, %v221_v10 }
 0x120   :  { %v274_v5 = vadd.f32 %v857_v42, %v262_v3  ;;  %v213_v13 = vsub.f32 1.5, %v212_v9  ;;  %v586_v14 = vpop.eup %585 }
 0x121   :  { %v204_v41 = vmul.f32 %v580_v50, %v203_v4  ;;  %v230_v18 = vmul.f32 %v586_v14, %v167_v61  ;;  %v223_v23 = vsub.f32 1.5, %v222_v16  ;;  %vm236_vm6 = vweird.f32 %v586_v14 }
 0x122   :  { %521 = vmatmul.msk.f32.gmra.mxu0 %vm73_vm0, %v274_v5  ;;  %v214_v17 = vmul.f32 %v582_v52, %v213_v13  ;;  %vm237_vm7 = vmor %vm235_vm5, %vm236_vm6  ;;  %v906_v5 = vld [vmem:[%s936_s4] ss:$0 sm:$0xff] }
 0x123   :  { %v208_v12 = vsel %vm207_vm13, %v580_v50, %v204_v41  ;;  %v231_v25 = vmul.f32 %v586_v14, %v230_v18  ;;  %v224_v29 = vmul.f32 %v584_v2, %v223_v23  ;;  %v372_v50 = vld [vmem:[#allocation2 + $0x50] sm:$0xff] }
 0x124   :  { %v252_v26 = vmul.f32 %v208_v12, %v792_v44  ;;  %v218_v24 = vsel %vm217_vm1, %v582_v52, %v214_v17  ;;  %v368_v52 = vld [vmem:[#allocation2 + $0x30] sm:$0xff] }
 0x125   :  { %v253_v28 = vmul.f32 %v218_v24, %v790_v43  ;;  %v232_v30 = vmul.f32 0.5, %v231_v25  ;;  %v228_v32 = vsel %vm227_vm4, %v584_v2, %v224_v29  ;;  %v445_v17 = vld [vmem:[#allocation5 + $0x70] sm:$0xff]  ;;  %v440_v24 = vld [vmem:[#allocation5 + $0x48] sm:$0xff] }
 0x126   :  { %v264_v22 = vmul.f32 %v848_v35, %v252_v26  ;;  %v254_v36 = vmul.f32 %v228_v32, %v781_v39  ;;  %v375_v39 = vld [vmem:[#allocation2 + $0x68] sm:$0xff]  ;;  %v441_v23 = vld [vmem:[#allocation5 + $0x50] sm:$0xff] }
 0x127   :  { %v265_v31 = vmul.f32 %v848_v35, %v253_v28  ;;  %v233_v33 = vsub.f32 1.5, %v232_v30  ;;  %384 = vmatpush.msra.mxu1 %v375_v39  ;;  %530 = vmatpush.msra.mxu3 %v375_v39  ;;  %v439_v28 = vld [vmem:[#allocation5 + $0x40] sm:$0xff]  ;;  %v438_v30 = vld [vmem:[#allocation5 + $0x38] sm:$0xff]  ;;  %v436_v32 = vld [vmem:[#allocation5 + $0x28] sm:$0xff] }
 0x128   :  { %v276_v44 = vadd.f32 %v857_v42, %v264_v22  ;;  %v266_v43 = vmul.f32 %v848_v35, %v254_v36  ;;  %v442_v22 = vld [vmem:[#allocation5 + $0x58] sm:$0xff]  ;;  %v435_v36 = vld [vmem:[#allocation5 + $0x20] sm:$0xff] }
 0x129   :  { %v277_v34 = vadd.f32 %v857_v42, %v265_v31  ;;  %v234_v37 = vmul.f32 %v586_v14, %v233_v33  ;;  %385 = vmatpush.msra.mxu1 %v374_v48  ;;  %531 = vmatpush.msra.mxu3 %v374_v48  ;;  %v437_v31 = vld [vmem:[#allocation5 + $0x30] sm:$0xff]  ;;  %v431_v39 = vld [vmem:[#allocation5] sm:$0xff] }
 0x12a   :  { %522 = vmatmul.msk.f32.gmra.mxu0 %vm73_vm0, %v275_v15  ;;  %v278_v40 = vadd.f32 %v857_v42, %v266_v43  ;;  %v434_v43 = vld [vmem:[#allocation5 + $0x18] sm:$0xff]  ;;  %v569_v48 = vld [vmem:[%s938_s6] ss:$0 sm:$0xff] }
 0x12b   :  { %v238_v38 = vsel %vm237_vm7, %v586_v14, %v234_v37  ;;  %386 = vmatpush.msra.mxu1 %v373_v49  ;;  %532 = vmatpush.msra.mxu3 %v373_v49 }
 0x12c   :  { %v255_v45 = vmul.f32 %v238_v38, %v804_v53  ;;  %v371_v53 = vld [vmem:[#allocation2 + $0x48] sm:$0xff] }
 0x12d   :  { %387 = vmatpush.msra.mxu1 %v372_v50  ;;  %533 = vmatpush.msra.mxu3 %v372_v50 }
 0x12e   :  { %v267_v46 = vmul.f32 %v848_v35, %v255_v45 }
 0x12f   :  { %388 = vmatpush.msra.mxu1 %v371_v53  ;;  %534 = vmatpush.msra.mxu3 %v371_v53 }
 0x130   :  { %v279_v47 = vadd.f32 %v857_v42, %v267_v46  ;;  %v433_v46 = vld [vmem:[#allocation5 + $0x10] sm:$0xff] }
 0x131   :  { %389 = vmatpush.msra.mxu1 %v370_v27  ;;  %535 = vmatpush.msra.mxu3 %v370_v27 }
 0x132   :  { %523 = vmatmul.msk.f32.gmra.mxu0 %vm73_vm0, %v276_v44 }
 0x133   :  { %390 = vmatpush.msra.mxu1 %v369_v51  ;;  %536 = vmatpush.msra.mxu3 %v369_v51 }
 0x135   :  { %391 = vmatpush.msra.mxu1 %v368_v52  ;;  %537 = vmatpush.msra.mxu3 %v368_v52 }
 0x137   :  { %392 = vmatpush.msra.mxu1 %v367_v54  ;;  %538 = vmatpush.msra.mxu3 %v367_v54 }
 0x139   :  { %393 = vmatpush.msra.mxu1 %v366_v55  ;;  %539 = vmatpush.msra.mxu3 %v366_v55 }
 0x13a   :  { %524 = vmatmul.msk.f32.gmra.mxu0 %vm73_vm0, %v277_v34 }
 0x13b   :  { %394 = vmatpush.msra.mxu1 %v365_v56  ;;  %540 = vmatpush.msra.mxu3 %v365_v56 }
 0x13d   :  { %395 = vmatpush.msra.mxu1 %v364_v57  ;;  %541 = vmatpush.msra.mxu3 %v364_v57 }
 0x13f   :  { %396 = vmatpush.msra.mxu1 %v363_v58  ;;  %542 = vmatpush.msra.mxu3 %v363_v58 }
 0x141   :  { %397 = vmatpush.msra.mxu1 %v362_v59  ;;  %543 = vmatpush.msra.mxu3 %v362_v59 }
 0x142   :  { %525 = vmatmul.msk.f32.gmra.mxu0 %vm73_vm0, %v278_v40 }
 0x14a   :  { %526 = vmatmul.msk.f32.gmra.mxu0 %vm73_vm0, %v279_v47  ;;  %v432_v47 = vld [vmem:[#allocation5 + $0x8] sm:$0xff] }
 0x180   :  { %v152_v60 = vpop.xlane.xlu0 %151 }
 0x181   :  { %v160_v61 = vmul.f32 %v152_v60, %v763_v20 }
 0x183   :  { %v168_v62 = vadd.f32 1e-05, %v160_v61 }
 0x185   :  { %587 = vrsqrt.f32 %v168_v62  ;;  %vm245_vm9 = vweird.f32 %v168_v62 }
 0x18b   :  { %v588_v63 = vpop.eup %587 }
 0x18c   :  { %v240_v0 = vmul.f32 %v588_v63, %v168_v62  ;;  %vm246_vm8 = vweird.f32 %v588_v63 }
 0x18d   :  { %vm247_vm10 = vmor %vm245_vm9, %vm246_vm8 }
 0x18e   :  { %v241_v1 = vmul.f32 %v588_v63, %v240_v0 }
 0x190   :  { %v242_v2 = vmul.f32 0.5, %v241_v1 }
 0x192   :  { %v243_v3 = vsub.f32 1.5, %v242_v2 }
 0x194   :  { %v244_v4 = vmul.f32 %v588_v63, %v243_v3 }
 0x196   :  { %v248_v6 = vsel %vm247_vm10, %v588_v63, %v244_v4 }
 0x197   :  { %v330_v7 = vpop.f32.mrf.mxu0  ;;  %v256_v20 = vmul.f32 %v248_v6, %v832_v11  ;;  %v446_v11 = vld [vmem:[#allocation5 + $0x78] sm:$0xff] }
 0x198   :  { %v331_v41 = vadd.f32 %v906_v5, %v330_v7  ;;  %451 = vmatpush.msra.mxu2 %v446_v11  ;;  %544 = vmatpush.msrb.mxu3 %v446_v11 }
 0x199   :  { %v268_v9 = vmul.f32 %v848_v35, %v256_v20  ;;  %v444_v35 = vld [vmem:[#allocation5 + $0x68] sm:$0xff]  ;;  %v570_v20 = vld [vmem:[%s940_s8] ss:$0 sm:$0xff]  ;;  %s672_s8 = smov [#allocation7]  }
 0x19a   :  { %v354_v8 = vmax.f32 %v331_v41, 0.0  ;;  %452 = vmatpush.msra.mxu2 %v445_v17  ;;  %545 = vmatpush.msrb.mxu3 %v445_v17  ;;  %s504_s26 = sshll.u32 %s672_s8, 4  ;;  %s505_s26 = int_to_ptr.vmem [resolvable:$true] %s504_s26 }
 0x19b   :  { %v280_v10 = vadd.f32 %v857_v42, %v268_v9 }
 0x19c   :  { %398 = vmatmul.f32.vlgmr.msra.gmra.mxu1 %v354_v8  ;;  %453 = vmatpush.msra.mxu2 %v444_v35 }
 0x19d   :  { %527 = vmatmul.msk.f32.gmra.mxu0 %vm73_vm0, %v280_v10  ;;  %546 = vmatpush.msrb.mxu3 %v444_v35 }
 0x19e   :  { %454 = vmatpush.msra.mxu2 %v443_v19 }
 0x19f   :  { %v333_v12 = vpop.f32.mrf.mxu0  ;;  %547 = vmatpush.msrb.mxu3 %v443_v19 }
 0x1a0   :  { %v334_v13 = vadd.f32 %v906_v5, %v333_v12  ;;  %455 = vmatpush.msra.mxu2 %v442_v22 }
 0x1a1   :  { %548 = vmatpush.msrb.mxu3 %v442_v22 }
 0x1a2   :  { %v355_v14 = vmax.f32 %v334_v13, 0.0  ;;  %456 = vmatpush.msra.mxu2 %v441_v23 }
 0x1a3   :  { %549 = vmatpush.msrb.mxu3 %v441_v23 }
 0x1a4   :  { %401 = vmatmul.f32.gmra.mxu1 %v355_v14  ;;  %457 = vmatpush.msra.mxu2 %v440_v24 }
 0x1a5   :  { %550 = vmatpush.msrb.mxu3 %v440_v24 }
 0x1a6   :  { %458 = vmatpush.msra.mxu2 %v439_v28 }
 0x1a7   :  { %v336_v15 = vpop.f32.mrf.mxu0  ;;  %551 = vmatpush.msrb.mxu3 %v439_v28 }
 0x1a8   :  { %v337_v26 = vadd.f32 %v906_v5, %v336_v15  ;;  %459 = vmatpush.msra.mxu2 %v438_v30 }
 0x1a9   :  { %552 = vmatpush.msrb.mxu3 %v438_v30 }
 0x1aa   :  { %v356_v16 = vmax.f32 %v337_v26, 0.0  ;;  %460 = vmatpush.msra.mxu2 %v437_v31 }
 0x1ab   :  { %553 = vmatpush.msrb.mxu3 %v437_v31 }
 0x1ac   :  { %404 = vmatmul.f32.gmra.mxu1 %v356_v16  ;;  %461 = vmatpush.msra.mxu2 %v436_v32 }
 0x1ad   :  { %554 = vmatpush.msrb.mxu3 %v436_v32 }
 0x1ae   :  { %462 = vmatpush.msra.mxu2 %v435_v36 }
 0x1af   :  { %v339_v18 = vpop.f32.mrf.mxu0  ;;  %555 = vmatpush.msrb.mxu3 %v435_v36 }
 0x1b0   :  { %v340_v42 = vadd.f32 %v906_v5, %v339_v18  ;;  %463 = vmatpush.msra.mxu2 %v434_v43 }
 0x1b1   :  { %556 = vmatpush.msrb.mxu3 %v434_v43 }
 0x1b2   :  { %v357_v21 = vmax.f32 %v340_v42, 0.0  ;;  %464 = vmatpush.msra.mxu2 %v433_v46 }
 0x1b3   :  { %557 = vmatpush.msrb.mxu3 %v433_v46 }
 0x1b4   :  { %407 = vmatmul.f32.gmra.mxu1 %v357_v21  ;;  %465 = vmatpush.msra.mxu2 %v432_v47 }
 0x1b5   :  { %558 = vmatpush.msrb.mxu3 %v432_v47 }
 0x1b6   :  { %466 = vmatpush.msra.mxu2 %v431_v39 }
 0x1b7   :  { %v342_v25 = vpop.f32.mrf.mxu0  ;;  %559 = vmatpush.msrb.mxu3 %v431_v39 }
 0x1b8   :  { %v343_v44 = vadd.f32 %v906_v5, %v342_v25 }
 0x1ba   :  { %v358_v29 = vmax.f32 %v343_v44, 0.0 }
 0x1bc   :  { %410 = vmatmul.f32.gmra.mxu1 %v358_v29 }
 0x1bf   :  { %v345_v33 = vpop.f32.mrf.mxu0 }
 0x1c0   :  { %v346_v34 = vadd.f32 %v906_v5, %v345_v33 }
 0x1c2   :  { %v359_v37 = vmax.f32 %v346_v34, 0.0 }
 0x1c4   :  { %413 = vmatmul.f32.gmra.mxu1 %v359_v37 }
 0x1c7   :  { %v348_v38 = vpop.f32.mrf.mxu0 }
 0x1c8   :  { %v349_v40 = vadd.f32 %v906_v5, %v348_v38 }
 0x1ca   :  { %v360_v45 = vmax.f32 %v349_v40, 0.0 }
 0x1cc   :  { %416 = vmatmul.f32.vlgmr.msra.gmra.mxu3 %v360_v45 }
 0x219   :  { %v399_v49 = vpop.f32.mrf.mxu1 }
 0x21a   :  { %v400_v50 = vadd.f32 %v569_v48, %v399_v49  ;;  %v351_v53 = vpop.f32.mrf.mxu0 }
 0x21b   :  { %v352_v27 = vadd.f32 %v906_v5, %v351_v53 }
 0x21c   :  { %v423_v51 = vmax.f32 %v400_v50, 0.0 }
 0x21d   :  { %v361_v52 = vmax.f32 %v352_v27, 0.0 }
 0x21e   :  { %467 = vmatmul.f32.vlgmr.msra.gmra.mxu2 %v423_v51 }
 0x21f   :  { %419 = vmatmul.f32.gmra.mxu3 %v361_v52 }
 0x221   :  { %v402_v54 = vpop.f32.mrf.mxu1 }
 0x222   :  { %v403_v55 = vadd.f32 %v569_v48, %v402_v54 }
 0x224   :  { %v424_v56 = vmax.f32 %v403_v55, 0.0 }
 0x226   :  { %470 = vmatmul.f32.gmra.mxu2 %v424_v56 }
 0x229   :  { %v405_v57 = vpop.f32.mrf.mxu1 }
 0x22a   :  { %v406_v58 = vadd.f32 %v569_v48, %v405_v57 }
 0x22c   :  { %v425_v59 = vmax.f32 %v406_v58, 0.0 }
 0x22e   :  { %473 = vmatmul.f32.gmra.mxu2 %v425_v59 }
 0x231   :  { %v408_v60 = vpop.f32.mrf.mxu1 }
 0x232   :  { %v409_v61 = vadd.f32 %v569_v48, %v408_v60 }
 0x234   :  { %v426_v62 = vmax.f32 %v409_v61, 0.0 }
 0x236   :  { %476 = vmatmul.f32.gmra.mxu2 %v426_v62 }
 0x239   :  { %v411_v63 = vpop.f32.mrf.mxu1 }
 0x23a   :  { %v412_v0 = vadd.f32 %v569_v48, %v411_v63 }
 0x23c   :  { %v427_v1 = vmax.f32 %v412_v0, 0.0 }
 0x23e   :  { %479 = vmatmul.f32.gmra.mxu2 %v427_v1 }
 0x241   :  { %v414_v2 = vpop.f32.mrf.mxu1 }
 0x242   :  { %v415_v3 = vadd.f32 %v569_v48, %v414_v2 }
 0x244   :  { %v428_v4 = vmax.f32 %v415_v3, 0.0 }
 0x246   :  { %482 = vmatmul.f32.gmra.mxu2 %v428_v4 }
 0x24f   :  { %v417_v5 = vpop.f32.mrf.mxu3 }
 0x250   :  { %v418_v6 = vadd.f32 %v569_v48, %v417_v5 }
 0x252   :  { %v429_v7 = vmax.f32 %v418_v6, 0.0 }
 0x254   :  { %485 = vmatmul.f32.vlgmr.msrb.gmra.mxu3 %v429_v7 }
 0x2a1   :  { %v468_v41 = vpop.f32.mrf.mxu2 }
 0x2a2   :  { %v469_v9 = vadd.f32 %v570_v20, %v468_v41  ;;  %v420_v8 = vpop.f32.mrf.mxu3 }
 0x2a3   :  { %v421_v10 = vadd.f32 %v569_v48, %v420_v8 }
 0x2a4   :  { %492 = vst [vmem:[#allocation7] sm:$0xff] %v469_v9 }
 0x2a5   :  { %v430_v12 = vmax.f32 %v421_v10, 0.0 }
 0x2a7   :  { %488 = vmatmul.f32.gmra.mxu3 %v430_v12 }
 0x2a9   :  { %v471_v13 = vpop.f32.mrf.mxu2 }
 0x2aa   :  { %v472_v14 = vadd.f32 %v570_v20, %v471_v13 }
 0x2ac   :  { %493 = vst [vmem:[#allocation7 + $0x8] sm:$0xff] %v472_v14 }
 0x2b1   :  { %v474_v15 = vpop.f32.mrf.mxu2 }
 0x2b2   :  { %v475_v26 = vadd.f32 %v570_v20, %v474_v15 }
 0x2b4   :  { %494 = vst [vmem:[#allocation7 + $0x10] sm:$0xff] %v475_v26 }
 0x2b9   :  { %v477_v16 = vpop.f32.mrf.mxu2 }
 0x2ba   :  { %v478_v11 = vadd.f32 %v570_v20, %v477_v16 }
 0x2bc   :  { %495 = vst [vmem:[#allocation7 + $0x18] sm:$0xff] %v478_v11 }
 0x2c1   :  { %v480_v17 = vpop.f32.mrf.mxu2 }
 0x2c2   :  { %v481_v35 = vadd.f32 %v570_v20, %v480_v17 }
 0x2c4   :  { %496 = vst [vmem:[#allocation7 + $0x20] sm:$0xff] %v481_v35 }
 0x2c9   :  { %v483_v18 = vpop.f32.mrf.mxu2 }
 0x2ca   :  { %v484_v42 = vadd.f32 %v570_v20, %v483_v18 }
 0x2cc   :  { %497 = vst [vmem:[#allocation7 + $0x28] sm:$0xff] %v484_v42 }
 0x2d7   :  { %v486_v19 = vpop.f32.mrf.mxu3 }
 0x2d8   :  { %v487_v21 = vadd.f32 %v570_v20, %v486_v19 }
 0x2da   :  { %498 = vst [vmem:[#allocation7 + $0x30] sm:$0xff] %v487_v21 }
 0x32a   :  { %v489_v22 = vpop.f32.mrf.mxu3 }
 0x32b   :  { %v490_v23 = vadd.f32 %v570_v20, %v489_v22 }
 0x32d   :  { %499 = vst [vmem:[#allocation7 + $0x38] sm:$0xff] %v490_v23 }
 0x32e   :  { %512 = dma.vmem_to_hbm [thread:$0]  %s505_s26, 1024, %s507_s29, [#allocation4], %s668_s17, %s668_s17, %s669_s18  }
 0x32f   :  { %665 = dma.done.wait [#allocation4], 1024  }
 0x330   :  { %666 = vsyncadd [#allocation4], 4294966272 }
 0x331   :  { %517 = vsyncpa [#allocation3], 1 }
 0x332   :  { %518 = vsyncpa [#allocation6], 1 }
 0x333   :  { %519 = vsyncpa [#allocation4], 1 }

</bundles_post_ra>
